<compile_context>
chip_gen: v6e
topology: v6e:2x2x1
jax: 0.10.0
libtpu: 0.0.40
codegen_flags: <defaults>
</compile_context>

<pallas_src>
import functools

import jax
import jax.numpy as jnp
from jax.experimental import pallas as pl
from jax.experimental.pallas import tpu as pltpu


def stdmn_kernel(x_ref, w1t_ref, b1s_ref, mtf_ref, mw2_ref, b2t_ref, o_ref, *, T, mem_num):
    # x_ref   : (TB, Dm)      bf16 -- L-pre-summed tokens (block of B*N rows)
    # w1t_ref : (Dm, Dmem)    bf16 -- l1 weight, transposed
    # b1s_ref : (1, Dmem)     f32  -- L * b1
    # mtf_ref : (Dmem, T*Mn)  bf16 -- M flattened: one matmul gives all T logit blocks
    # mw2_ref : (Mn, T*Dm)    bf16 -- M[t] @ W2^T flattened: value + l2 fused
    # b2t_ref : (1, T*Dm)     f32  -- b2 tiled over T
    # o_ref   : (TB, T*Dm)    f32
    Mn = mem_num
    TB = x_ref.shape[0]

    # ---- l1 (already summed over L): hs = x_sum @ W1^T + L*b1 ----
    hs = jnp.dot(x_ref[...], w1t_ref[...], preferred_element_type=jnp.float32)
    hs = hs + b1s_ref[...]                                          # (TB, Dmem) f32

    # ---- attention logits for all T memory slices in one MXU push ----
    logits = jnp.dot(hs.astype(mtf_ref.dtype), mtf_ref[...],
                     preferred_element_type=jnp.float32)            # (TB, T*Mn) f32

    # ---- per-t softmax over mem_num, summed over t (the score's time axis is
    #      contracted away by einsum 'blnm,tmd->btnd') ----
    s_acc = jnp.zeros((TB, Mn), dtype=jnp.float32)
    for t in range(T):                                              # static, VPU/XLU/EUP only
        lt = logits[:, t * Mn:(t + 1) * Mn]
        lt = lt - jnp.max(lt, axis=-1, keepdims=True)
        e = jnp.exp(lt)
        s_acc = s_acc + e * pl.reciprocal(jnp.sum(e, axis=-1, keepdims=True), approx=True)

    # ---- value + l2 fused: one (TB,Mn)@(Mn,T*Dm) matmul, one lane-dense store ----
    out = jnp.dot(s_acc.astype(mw2_ref.dtype), mw2_ref[...],
                  preferred_element_type=jnp.float32) + b2t_ref[...]
    o_ref[...] = out
    # TODO(synk): nn.Dropout(0.1) is identity in eval mode; training-time dropout not implemented.


def stdmn_forward(x, M, w1, b1, w2, b2):
    B, L, N, Dm = x.shape
    T, Mn, Dmem = M.shape
    TOK = B * N

    # ---- parameter / input reshuffling (plain-JAX glue, once per call) ----
    # sum over L commutes with l1; sum in f32, then cast matmul operands to bf16.
    x_sum = x.sum(axis=1).reshape(TOK, Dm).astype(jnp.bfloat16)               # (B*N, Dm)
    w1t = w1.T.astype(jnp.bfloat16)                                           # (Dm, Dmem)
    b1s = (L * b1).reshape(1, Dmem).astype(jnp.float32)                       # L-scaled bias
    mtf = jnp.transpose(M, (2, 0, 1)).reshape(Dmem, T * Mn).astype(jnp.bfloat16)
    mw2 = jnp.einsum('tmd,od->mto', M, w2).reshape(Mn, T * Dm).astype(jnp.bfloat16)
    b2t = jnp.tile(b2, T).reshape(1, T * Dm).astype(jnp.float32)

    # Token blocking: 2 parallel blocks when legal (keeps both v7x TCs busy; on
    # v5e/v6e it is just 2 cheap serial steps), otherwise a single grid step.
    if TOK % 2 == 0 and (TOK // 2) % 8 == 0:
        num_blocks = 2
    else:
        num_blocks = 1
    TB = TOK // num_blocks

    out_flat = pl.pallas_call(
        functools.partial(stdmn_kernel, T=T, mem_num=Mn),
        out_shape=jax.ShapeDtypeStruct((TOK, T * Dm), jnp.float32),
        grid_spec=pltpu.PrefetchScalarGridSpec(
            num_scalar_prefetch=0,
            grid=(num_blocks,),
            in_specs=[
                pl.BlockSpec((TB, Dm), lambda i: (i, 0)),
                pl.BlockSpec((Dm, Dmem), lambda i: (0, 0)),
                pl.BlockSpec((1, Dmem), lambda i: (0, 0)),
                pl.BlockSpec((Dmem, T * Mn), lambda i: (0, 0)),
                pl.BlockSpec((Mn, T * Dm), lambda i: (0, 0)),
                pl.BlockSpec((1, T * Dm), lambda i: (0, 0)),
            ],
            out_specs=pl.BlockSpec((TB, T * Dm), lambda i: (i, 0)),
        ),
        compiler_params=pltpu.CompilerParams(dimension_semantics=("parallel",)),
    )(x_sum, w1t, b1s, mtf, mw2, b2t)

    # (B*N, T*Dm) -> (B, T, N, Dm): layout plumbing outside the kernel.
    return out_flat.reshape(B, N, T, Dm).transpose(0, 2, 1, 3)


def init_params(key, T, num_nodes, model_dim, mem_num, mem_dim):
    k_m, k_w1, k_b1, k_w2, k_b2 = jax.random.split(key, 5)

    # M: xavier_normal_ -> std = sqrt(2 / (fan_in + fan_out))
    fan_in = mem_num * mem_dim
    fan_out = T * mem_dim
    std = (2.0 / (fan_in + fan_out)) ** 0.5
    M = std * jax.random.normal(k_m, (T, mem_num, mem_dim), dtype=jnp.float32)

    # nn.Linear default init: U(-1/sqrt(in_features), 1/sqrt(in_features))
    bound1 = 1.0 / (model_dim ** 0.5)
    w1 = jax.random.uniform(k_w1, (mem_dim, model_dim), jnp.float32, -bound1, bound1)
    b1 = jax.random.uniform(k_b1, (mem_dim,), jnp.float32, -bound1, bound1)

    bound2 = 1.0 / (mem_dim ** 0.5)
    w2 = jax.random.uniform(k_w2, (model_dim, mem_dim), jnp.float32, -bound2, bound2)
    b2 = jax.random.uniform(k_b2, (model_dim,), jnp.float32, -bound2, bound2)

    return M, w1, b1, w2, b2


if __name__ == "__main__":
    # Small, module-consistent shapes.
    B, L = 2, 4            # batch, input sequence length
    T = 4                  # memory time steps (output time dim)
    N = 16                 # num_nodes
    model_dim = 32
    mem_num = 8
    mem_dim = 64

    key = jax.random.PRNGKey(0)
    k_params, k_x = jax.random.split(key)
    M, w1, b1, w2, b2 = init_params(k_params, T, N, model_dim, mem_num, mem_dim)

    x = jax.random.normal(k_x, (B, L, N, model_dim), dtype=jnp.float32)

    out = stdmn_forward(x, M, w1, b1, w2, b2)
    out = jax.block_until_ready(out)
    assert out.shape == (B, T, N, model_dim), out.shape
    print("KERNEL_OK")
</pallas_src>

<mosaic_0001>
module attributes {stable_mosaic.version = 11 : i64} {
  func.func @stdmn_kernel(%arg0: i32, %arg1: memref<16x32xbf16, #tpu.memory_space<vmem>>, %arg2: memref<32x64xbf16, #tpu.memory_space<vmem>>, %arg3: memref<1x64xf32, #tpu.memory_space<vmem>>, %arg4: memref<64x32xbf16, #tpu.memory_space<vmem>>, %arg5: memref<8x128xbf16, #tpu.memory_space<vmem>>, %arg6: memref<1x128xf32, #tpu.memory_space<vmem>>, %arg7: memref<16x128xf32, #tpu.memory_space<vmem>>) attributes {dimension_semantics = [#tpu.dimension_semantics<parallel>], iteration_bounds = array<i64: 2>, scalar_prefetch = 0 : i64, scratch_operands = 0 : i64, tpu.core_type = #tpu.core_type<tc>, window_params = [{transform_indices = @transform_0, window_bounds = array<i64: 16, 32>}, {pipeline_mode = #tpu.pipeline_mode<synchronous>, transform_indices = @transform_1, window_bounds = array<i64: 32, 64>}, {pipeline_mode = #tpu.pipeline_mode<synchronous>, transform_indices = @transform_2, window_bounds = array<i64: 1, 64>}, {pipeline_mode = #tpu.pipeline_mode<synchronous>, transform_indices = @transform_3, window_bounds = array<i64: 64, 32>}, {pipeline_mode = #tpu.pipeline_mode<synchronous>, transform_indices = @transform_4, window_bounds = array<i64: 8, 128>}, {pipeline_mode = #tpu.pipeline_mode<synchronous>, transform_indices = @transform_5, window_bounds = array<i64: 1, 128>}, {transform_indices = @transform_6, window_bounds = array<i64: 16, 128>}]} {
    %c0 = arith.constant 0 : index
    %c0_0 = arith.constant 0 : index
    %0 = vector.load %arg1[%c0, %c0_0] : memref<16x32xbf16, #tpu.memory_space<vmem>>, vector<16x32xbf16>
    %c0_1 = arith.constant 0 : index
    %c0_2 = arith.constant 0 : index
    %1 = vector.load %arg2[%c0_1, %c0_2] : memref<32x64xbf16, #tpu.memory_space<vmem>>, vector<32x64xbf16>
    %cst = arith.constant dense<0.000000e+00> : vector<16x64xf32>
    %2 = tpu.matmul %0, %1, %cst {dimension_numbers = #tpu.dot_dimension_numbers<[1], [0], [0], [1], [0, 0, 1, 1], [], []>} : vector<16x32xbf16>, vector<32x64xbf16>, vector<16x64xf32> -> vector<16x64xf32>
    %c0_3 = arith.constant 0 : index
    %c0_4 = arith.constant 0 : index
    %3 = vector.load %arg3[%c0_3, %c0_4] : memref<1x64xf32, #tpu.memory_space<vmem>>, vector<1x64xf32>
    %4 = vector.broadcast %3 : vector<1x64xf32> to vector<16x64xf32>
    %5 = arith.addf %2, %4 : vector<16x64xf32>
    %6 = arith.truncf %5 : vector<16x64xf32> to vector<16x64xbf16>
    %c0_5 = arith.constant 0 : index
    %c0_6 = arith.constant 0 : index
    %7 = vector.load %arg4[%c0_5, %c0_6] : memref<64x32xbf16, #tpu.memory_space<vmem>>, vector<64x32xbf16>
    %cst_7 = arith.constant dense<0.000000e+00> : vector<16x32xf32>
    %8 = tpu.matmul %6, %7, %cst_7 {dimension_numbers = #tpu.dot_dimension_numbers<[1], [0], [0], [1], [0, 0, 1, 1], [], []>} : vector<16x64xbf16>, vector<64x32xbf16>, vector<16x32xf32> -> vector<16x32xf32>
    %cst_8 = arith.constant 0.000000e+00 : f32
    %9 = vector.broadcast %cst_8 : f32 to vector<16x8xf32>
    %10 = vector.extract_strided_slice %8 {offsets = [0, 0], sizes = [16, 8], strides = [1, 1]} : vector<16x32xf32> to vector<16x8xf32>
    %cst_9 = arith.constant dense<0xFF800000> : vector<16xf32>
    %11 = vector.multi_reduction <maximumf>, %10, %cst_9 [1] : vector<16x8xf32> to vector<16xf32>
    %12 = vector.shape_cast %11 : vector<16xf32> to vector<16x1xf32>
    %13 = vector.broadcast %12 : vector<16x1xf32> to vector<16x8xf32>
    %14 = arith.subf %10, %13 : vector<16x8xf32>
    %15 = math.exp %14 : vector<16x8xf32>
    %cst_10 = arith.constant dense<0.000000e+00> : vector<16xf32>
    %16 = vector.multi_reduction <add>, %15, %cst_10 [1] : vector<16x8xf32> to vector<16xf32>
    %17 = vector.shape_cast %16 : vector<16xf32> to vector<16x1xf32>
    %18 = tpu.reciprocal %17 {approx = true} : vector<16x1xf32> -> vector<16x1xf32>
    %19 = vector.broadcast %18 : vector<16x1xf32> to vector<16x8xf32>
    %20 = arith.mulf %15, %19 : vector<16x8xf32>
    %21 = arith.addf %9, %20 : vector<16x8xf32>
    %22 = vector.extract_strided_slice %8 {offsets = [0, 8], sizes = [16, 8], strides = [1, 1]} : vector<16x32xf32> to vector<16x8xf32>
    %cst_11 = arith.constant dense<0xFF800000> : vector<16xf32>
    %23 = vector.multi_reduction <maximumf>, %22, %cst_11 [1] : vector<16x8xf32> to vector<16xf32>
    %24 = vector.shape_cast %23 : vector<16xf32> to vector<16x1xf32>
    %25 = vector.broadcast %24 : vector<16x1xf32> to vector<16x8xf32>
    %26 = arith.subf %22, %25 : vector<16x8xf32>
    %27 = math.exp %26 : vector<16x8xf32>
    %cst_12 = arith.constant dense<0.000000e+00> : vector<16xf32>
    %28 = vector.multi_reduction <add>, %27, %cst_12 [1] : vector<16x8xf32> to vector<16xf32>
    %29 = vector.shape_cast %28 : vector<16xf32> to vector<16x1xf32>
    %30 = tpu.reciprocal %29 {approx = true} : vector<16x1xf32> -> vector<16x1xf32>
    %31 = vector.broadcast %30 : vector<16x1xf32> to vector<16x8xf32>
    %32 = arith.mulf %27, %31 : vector<16x8xf32>
    %33 = arith.addf %21, %32 : vector<16x8xf32>
    %34 = vector.extract_strided_slice %8 {offsets = [0, 16], sizes = [16, 8], strides = [1, 1]} : vector<16x32xf32> to vector<16x8xf32>
    %cst_13 = arith.constant dense<0xFF800000> : vector<16xf32>
    %35 = vector.multi_reduction <maximumf>, %34, %cst_13 [1] : vector<16x8xf32> to vector<16xf32>
    %36 = vector.shape_cast %35 : vector<16xf32> to vector<16x1xf32>
    %37 = vector.broadcast %36 : vector<16x1xf32> to vector<16x8xf32>
    %38 = arith.subf %34, %37 : vector<16x8xf32>
    %39 = math.exp %38 : vector<16x8xf32>
    %cst_14 = arith.constant dense<0.000000e+00> : vector<16xf32>
    %40 = vector.multi_reduction <add>, %39, %cst_14 [1] : vector<16x8xf32> to vector<16xf32>
    %41 = vector.shape_cast %40 : vector<16xf32> to vector<16x1xf32>
    %42 = tpu.reciprocal %41 {approx = true} : vector<16x1xf32> -> vector<16x1xf32>
    %43 = vector.broadcast %42 : vector<16x1xf32> to vector<16x8xf32>
    %44 = arith.mulf %39, %43 : vector<16x8xf32>
    %45 = arith.addf %33, %44 : vector<16x8xf32>
    %46 = vector.extract_strided_slice %8 {offsets = [0, 24], sizes = [16, 8], strides = [1, 1]} : vector<16x32xf32> to vector<16x8xf32>
    %cst_15 = arith.constant dense<0xFF800000> : vector<16xf32>
    %47 = vector.multi_reduction <maximumf>, %46, %cst_15 [1] : vector<16x8xf32> to vector<16xf32>
    %48 = vector.shape_cast %47 : vector<16xf32> to vector<16x1xf32>
    %49 = vector.broadcast %48 : vector<16x1xf32> to vector<16x8xf32>
    %50 = arith.subf %46, %49 : vector<16x8xf32>
    %51 = math.exp %50 : vector<16x8xf32>
    %cst_16 = arith.constant dense<0.000000e+00> : vector<16xf32>
    %52 = vector.multi_reduction <add>, %51, %cst_16 [1] : vector<16x8xf32> to vector<16xf32>
    %53 = vector.shape_cast %52 : vector<16xf32> to vector<16x1xf32>
    %54 = tpu.reciprocal %53 {approx = true} : vector<16x1xf32> -> vector<16x1xf32>
    %55 = vector.broadcast %54 : vector<16x1xf32> to vector<16x8xf32>
    %56 = arith.mulf %51, %55 : vector<16x8xf32>
    %57 = arith.addf %45, %56 : vector<16x8xf32>
    %58 = arith.truncf %57 : vector<16x8xf32> to vector<16x8xbf16>
    %c0_17 = arith.constant 0 : index
    %c0_18 = arith.constant 0 : index
    %59 = vector.load %arg5[%c0_17, %c0_18] : memref<8x128xbf16, #tpu.memory_space<vmem>>, vector<8x128xbf16>
    %cst_19 = arith.constant dense<0.000000e+00> : vector<16x128xf32>
    %60 = tpu.matmul %58, %59, %cst_19 {dimension_numbers = #tpu.dot_dimension_numbers<[1], [0], [0], [1], [0, 0, 1, 1], [], []>} : vector<16x8xbf16>, vector<8x128xbf16>, vector<16x128xf32> -> vector<16x128xf32>
    %c0_20 = arith.constant 0 : index
    %c0_21 = arith.constant 0 : index
    %61 = vector.load %arg6[%c0_20, %c0_21] : memref<1x128xf32, #tpu.memory_space<vmem>>, vector<1x128xf32>
    %62 = vector.broadcast %61 : vector<1x128xf32> to vector<16x128xf32>
    %63 = arith.addf %60, %62 : vector<16x128xf32>
    %c0_22 = arith.constant 0 : index
    %c0_23 = arith.constant 0 : index
    %64 = vector.load %arg7[%c0_22, %c0_23] : memref<16x128xf32, #tpu.memory_space<vmem>>, vector<16x128xf32>
    tpu.vector_store %arg7[%c0_22, %c0_23], %63 {strides = array<i32>} : memref<16x128xf32, #tpu.memory_space<vmem>>, vector<16x128xf32>,
    return
  }
  func.func @transform_0(%arg0: i32) -> (i32, i32) {
    %c0_i32 = arith.constant 0 : i32
    %c0_i32_0 = arith.constant 0 : i32
    return %arg0, %c0_i32 : i32, i32
  }
  func.func @transform_1(%arg0: i32) -> (i32, i32) {
    %c0_i32 = arith.constant 0 : i32
    %c0_i32_0 = arith.constant 0 : i32
    %c0_i32_1 = arith.constant 0 : i32
    return %c0_i32, %c0_i32_0 : i32, i32
  }
  func.func @transform_2(%arg0: i32) -> (i32, i32) {
    %c0_i32 = arith.constant 0 : i32
    %c0_i32_0 = arith.constant 0 : i32
    %c0_i32_1 = arith.constant 0 : i32
    return %c0_i32, %c0_i32_0 : i32, i32
  }
  func.func @transform_3(%arg0: i32) -> (i32, i32) {
    %c0_i32 = arith.constant 0 : i32
    %c0_i32_0 = arith.constant 0 : i32
    %c0_i32_1 = arith.constant 0 : i32
    return %c0_i32, %c0_i32_0 : i32, i32
  }
  func.func @transform_4(%arg0: i32) -> (i32, i32) {
    %c0_i32 = arith.constant 0 : i32
    %c0_i32_0 = arith.constant 0 : i32
    %c0_i32_1 = arith.constant 0 : i32
    return %c0_i32, %c0_i32_0 : i32, i32
  }
  func.func @transform_5(%arg0: i32) -> (i32, i32) {
    %c0_i32 = arith.constant 0 : i32
    %c0_i32_0 = arith.constant 0 : i32
    %c0_i32_1 = arith.constant 0 : i32
    return %c0_i32, %c0_i32_0 : i32, i32
  }
  func.func @transform_6(%arg0: i32) -> (i32, i32) {
    %c0_i32 = arith.constant 0 : i32
    %c0_i32_0 = arith.constant 0 : i32
    return %arg0, %c0_i32 : i32, i32
  }
}

</mosaic_0001>

<bundles_post_ra>
// kernel: tpu_custom_call.1
= control target key start
LH: loop header
LB: loop body
LE: loop exit
PB: predicated region body
PF: predicated region fallthrough
CT: control target
= control target key end

     0   :  { %11 = vsyncpa [#allocation3], 0  ;;  %s1139_s0 = inlined_call_operand.vmem [shape: bf16[32,32], index: 0, kind: input, shape index: {}]   ;;  %s1140_s1 = inlined_call_operand.vmem [shape: bf16[32,64], index: 1, kind: input, shape index: {}]   ;;  %s1141_s2 = inlined_call_operand.vmem [shape: f32[1,64], index: 2, kind: input, shape index: {}]   ;;  %s1142_s3 = inlined_call_operand.vmem [shape: bf16[64,32], index: 3, kind: input, shape index: {}]   ;;  %s1143_s4 = inlined_call_operand.vmem [shape: bf16[8,128], index: 4, kind: input, shape index: {}]   ;;  %s1144_s5 = inlined_call_operand.vmem [shape: f32[1,128], index: 5, kind: input, shape index: {}]   ;;  %s1145_s6 = inlined_call_operand.hbm [shape: f32[32,128], index: 6, kind: output, shape index: {}]  }
   0x1   :  { %13 = vsyncpa [#allocation3 + $0x1], 0  ;;  %s941_s21 = smov 0   ;;  %s943_s22 = smov 0  }
   0x2   :  { %s945_s23 = smov 0   ;;  %s947_s24 = smov 0  }
   0x3 LB: > { %s962_s25 = sadd.s32 4294967295, %s896_s24   ;;  %s690_s26 = sadd.s32 4294967294, %s896_s24   ;;  %s896_s24 = sphi %s947_s24, %s1151_s24   ;;  %s892_s23 = sphi %s945_s23, %s1150_s23   ;;  %s888_s22 = sphi %s943_s22, %s1149_s22   ;;  %s884_s21 = sphi %s941_s21, %s1148_s21  }
   0x4   : > { %s966_s27 = sadd.s32 1, %s896_s24   ;;  %s157_s28 = sadd.s32 1, %s892_s23 }
   0x5   : > { %s154_s29 = ssub.s32 %s896_s24, %s966_s27  ;;  %p167_p0 = scmp.ne.s32.totalorder %s892_s23, %s888_s22 }
   0x6   : > { %p155_p1 = scmp.eq.s32.totalorder %s154_s29, 0  ;;  %p168_p2 = scmp.eq.s32.totalorder %s962_s25, 1 }
   0x7   : > { %p173_p3 = scmp.ne.s32.totalorder %s888_s22, %s884_s21  ;;  %p174_p4 = scmp.eq.s32.totalorder %s690_s26, 1 }
   0x8   : > { %s977_s30 = scalar_select %p155_p1, %s892_s23, %s157_s28  }
   0x9   : > { %p979_p5 = por %p168_p2, %p167_p0  ;;  %p983_p6 = por %p174_p4, %p173_p3 }
   0xa   : > { %p693_p7 = scmp.ge.s32.totalorder %s896_s24, 1  ;;  %p216_p8 = scmp.lt.s32.totalorder %s896_s24, 3 }
   0xc   : > { %p217_p9 = pnand %p693_p7, %p216_p8 }
   0xd   : > { %s695_s13 = sshll.u32 (!%p217_p9), %s962_s25, 1  ;;  %s901_s14 = smov (!%p217_p9), 120  }
   0xe   : > { %220 = sbr.rel (%p217_p9) target bundleno = 1198 (0x4ae), region = 44  ;;  %p247_p10 = scmp.lt.s32.totalorder (!%p217_p9), %s695_s13, 3 }
   0xf   : > { %s902_s15 = smov (!%p217_p9), 104   ;;  %s714_s9 = sshll.u32 (!%p217_p9), %s962_s25, 8 }
  0x10   : > { %s1097_s12 = scalar_lea.hbm (!%p217_p9), %s1145_s6, %s714_s9  ;;  %s903_s25 = smov (!%p217_p9), [#allocation2]  }
  0x13   : > { %v797_v0 = vld [vmem:[%s1140_s1 + $0x8] sm:$0xff]   ;;  %v898_v1 = vmov 0.0   ;;  %v798_v2 = vld [vmem:[%s1140_s1] sm:$0xff]   ;;  %vm899_vm0 = vmmov 0   ;;  %v800_v3 = vld [vmem:[%s1142_s3 + $0x18] sm:$0xff]   ;;  %s1153_s13 = smov (!%p247_p10, %s695_s13), 3 }
  0x14   : > { %725 = vmatprep.subr.bf16.mxu0 %v898_v1  ;;  %733 = vmatprep.subr.bf16.mxu1 %v898_v1  ;;  %v801_v4 = vld [vmem:[%s1142_s3 + $0x10] sm:$0xff]   ;;  %s696_s18 = sshll.u32 %s1153_s13, 2  ;;  %vm284_vm1 = vcmask 261120   ;;  %v802_v6 = vld [vmem:[%s1142_s3 + $0x8] sm:$0xff]   ;;  %v803_v7 = vld [vmem:[%s1142_s3] sm:$0xff]   ;;  %vm362_vm2 = vcmask 523264  }
  0x15   : > { %726 = vmatpush3.bf16.msra.mxu0 %v797_v0  ;;  %729 = vmatprep.mubr.msk.bf16.mxu0 %vm899_vm0, %v898_v1  ;;  %s250_s26 = scalar_lea.vmem %s1139_s0, %s696_s18  ;;  %v697_v9 = vld [vmem:[%s1141_s2] ss:$0 sm:$0xff]  ;;  %vm473_vm3 = vcmask 195712   ;;  %vm432_vm4 = vcmask 130112   ;;  %vm514_vm5 = vcmask 261312   ;;  %s900_s13 = smov 112  }
  0x16   : > { %727 = vmatprep.subr.bf16.mxu0 %v898_v1  ;;  %741 = vmatprep.mubr.msk.bf16.mxu1 %vm899_vm0, %v898_v1  ;;  %v799_v5 = vld [vmem:[%s250_s26] sm:$0xff]   ;;  %vm407_vm6 = vcmask 64512   ;;  %vm567_vm7 = vcmask 1043456   ;;  %s243_s18 = sand.u32 1, %s888_s22  }
  0x17   : > { %734 = vmatpush3.bf16.msra.mxu1 %v800_v3  ;;  %s694_s19 = sshll.u32 %s243_s18, 4 }
  0x18   : > { %735 = vmatprep.subr.bf16.mxu1 %v898_v1  ;;  %s245_s28 = scalar_lea.vmem [#allocation2], %s694_s19 }
  0x19   : > { %728 = vmatpush3.bf16.msra.mxu0 %v798_v2  ;;  %s628_s29 = sshll.u32 %s245_s28, 4  ;;  %s1092_s29 = int_to_ptr.vmem [resolvable:$true] %s628_s29 }
  0x1a   : > { %745 = vmatprep.subr.bf16.mxu0 %v898_v1 }
  0x1b   : > { %736 = vmatpush3.bf16.msra.mxu1 %v801_v4 }
  0x1c   : > { %737 = vmatprep.subr.bf16.mxu1 %v898_v1  ;;  %730 = vmatmul.mubr.msk.bf16.vlgmr.msra.gmra.mxu0 %vm284_vm1, %v799_v5 }
  0x1d   : > { %747 = vmatprep.mubr.msk.bf16.mxu0 %vm899_vm0, %v898_v1 }
  0x1f   : > { %738 = vmatpush3.bf16.msra.mxu1 %v802_v6 }
  0x20   : > { %739 = vmatprep.subr.bf16.mxu1 %v898_v1 }
  0x23   : > { %740 = vmatpush3.bf16.msra.mxu1 %v803_v7 }
  0xdc   : > { %v322_v8 = vpop.f32.mrf.mxu0 }
  0xdd   : > { %v323_v12 = vadd.f32 %v697_v9, %v322_v8 }
  0xde   : > { %v731_v10 = vpop.f32.mrf.mxu0 }
  0xe0   : > { %v325_v11 = vpop.f32.mrf.mxu0 }
  0xe1   : > { %v326_v13 = vadd.f32 %v697_v9, %v325_v11 }
  0xe2   : > { %v732_v14 = vpop.f32.mrf.mxu0 }
  0xe3   : > { %v329_v15 = vpack.c.bf16 %v326_v13, %v323_v12 }
  0xe5   : > { %742 = vmatmul.mubr.msk.bf16.vlgmr.msra.gmra.mxu1 %vm362_vm2, %v329_v15 }
 0x1a5   : > { %v1017_v16 = vpop.f32.mrf.mxu1 }
 0x1a6   : > { %v474_v17 = vsel %vm473_vm3, %v1017_v16, -inf  ;;  %v433_v18 = vsel %vm432_vm4, %v1017_v16, -inf  ;;  %v515_v25 = vsel %vm514_vm5, %v1017_v16, -inf  ;;  %v408_v50 = vsel %vm407_vm6, %v1017_v16, -inf }
 0x1a7   : > { %475 = vmax.xlane.f32.xlu1 %v474_v17  ;;  %434 = vmax.xlane.f32.xlu0 %v433_v18  ;;  %v743_v19 = vpop.f32.mrf.mxu1  ;;  %v556_v18 = vld [vmem:[%s1143_s4] sm:$0xf] }
 0x1a8   : > { %v569_v19 = vsel %vm567_vm7, %v556_v18, 0 }
 0x1a9   : > { %v1021_v20 = vpop.f32.mrf.mxu1  ;;  %746 = vmatpush3.bf16.msra.mxu0 %v569_v19 }
 0x1aa   : > { %v477_v21 = vsel %vm473_vm3, %v1021_v20, -inf  ;;  %v436_v22 = vsel %vm432_vm4, %v1021_v20, -inf  ;;  %v518_v24 = vsel %vm514_vm5, %v1021_v20, -inf  ;;  %v411_v51 = vsel %vm407_vm6, %v1021_v20, -inf }
 0x1ab   : > { %478 = vmax.xlane.f32.xlu1 %v477_v21  ;;  %437 = vmax.xlane.f32.xlu0 %v436_v22  ;;  %v744_v23 = vpop.f32.mrf.mxu1 }
 0x1af   : > { %519 = vmax.xlane.f32.xlu1 %v518_v24  ;;  %516 = vmax.xlane.f32.xlu0 %v515_v25 }
 0x230   : > { %v476_v26 = vpop.xlane.xlu1 %475  ;;  %v435_v27 = vpop.xlane.xlu0 %434 }
 0x231   : > { %v480_v28 = vsub.f32 %v1017_v16, %v476_v26  ;;  %v439_v29 = vsub.f32 %v1017_v16, %v435_v27 }
 0x233   : > { %v482_v30 = vmul.f32 1.442695, %v480_v28  ;;  %v441_v31 = vmul.f32 1.442695, %v439_v29 }
 0x234   : > { %v479_v32 = vpop.xlane.xlu1 %478  ;;  %v438_v33 = vpop.xlane.xlu0 %437 }
 0x235   : > { %804 = vpow2.f32 %v482_v30  ;;  %v481_v34 = vsub.f32 %v1021_v20, %v479_v32  ;;  %v440_v35 = vsub.f32 %v1021_v20, %v438_v33 }
 0x236   : > { %806 = vpow2.f32 %v441_v31 }
 0x237   : > { %v443_v36 = vmul.f32 1.442695, %v440_v35  ;;  %v484_v39 = vmul.f32 1.442695, %v481_v34 }
 0x238   : > { %v520_v37 = vpop.xlane.xlu1 %519  ;;  %v517_v38 = vpop.xlane.xlu0 %516 }
 0x239   : > { %v521_v40 = vsub.f32 %v1017_v16, %v517_v38  ;;  %808 = vpow2.f32 %v443_v36  ;;  %v522_v41 = vsub.f32 %v1021_v20, %v520_v37 }
 0x23a   : > { %810 = vpow2.f32 %v484_v39 }
 0x23b   : > { %v523_v42 = vmul.f32 1.442695, %v521_v40  ;;  %v525_v43 = vmul.f32 1.442695, %v522_v41 }
 0x23d   : > { %812 = vpow2.f32 %v523_v42 }
 0x23e   : > { %814 = vpow2.f32 %v525_v43 }
 0x242   : > { %v1033_v44 = vpop.eup %804 }
 0x243   : > { %v1035_v45 = vpop.eup %806  ;;  %488 = vrot.lane.b32.xlu1 %v1033_v44, %s900_s13 }
 0x244   : > { %447 = vrot.lane.b32.xlu0 %v1035_v45, %s901_s14 }
 0x246   : > { %v1041_v46 = vpop.eup %808 }
 0x247   : > { %449 = vrot.lane.b32.xlu1 %v1041_v46, %s901_s14  ;;  %v1045_v47 = vpop.eup %810 }
 0x24a   : > { %v1047_v48 = vpop.eup %812 }
 0x24b   : > { %490 = vrot.lane.b32.xlu1 %v1045_v47, %s900_s13  ;;  %529 = vrot.lane.b32.xlu0 %v1047_v48, %s902_s15  ;;  %v1053_v49 = vpop.eup %814 }
 0x24f   : > { %531 = vrot.lane.b32.xlu1 %v1053_v49, %s902_s15 }
 0x26a   : > { %409 = vmax.xlane.f32.xlu0 %v408_v50 }
 0x273   : > { %412 = vmax.xlane.f32.xlu1 %v411_v51 }
 0x2b5   : > { %v489_v52 = vpop.permute.xlu1 %488 }
 0x2b6   : > { %v448_v53 = vpop.permute.xlu0 %447  ;;  %v494_v56 = vsel %vm407_vm6, %v489_v52, 0.0 }
 0x2b7   : > { %v453_v54 = vsel %vm407_vm6, %v448_v53, 0.0 }
 0x2b8   : > { %454 = vadd.xlane.f32.xlu0 %v453_v54 }
 0x2b9   : > { %v450_v55 = vpop.permute.xlu1 %449 }
 0x2ba   : > { %v456_v58 = vsel %vm407_vm6, %v450_v55, 0.0 }
 0x2bc   : > { %495 = vadd.xlane.f32.xlu0 %v494_v56 }
 0x2bd   : > { %v491_v57 = vpop.permute.xlu1 %490  ;;  %v530_v60 = vpop.permute.xlu0 %529 }
 0x2be   : > { %v497_v59 = vsel %vm407_vm6, %v491_v57, 0.0  ;;  %v535_v62 = vsel %vm407_vm6, %v530_v60, 0.0 }
 0x2bf   : > { %498 = vadd.xlane.f32.xlu1 %v497_v59 }
 0x2c0   : > { %457 = vadd.xlane.f32.xlu0 %v456_v58 }
 0x2c1   : > { %v532_v61 = vpop.permute.xlu1 %531 }
 0x2c2   : > { %v538_v63 = vsel %vm407_vm6, %v532_v61, 0.0 }
 0x2c3   : > { %539 = vadd.xlane.f32.xlu1 %v538_v63 }
 0x2c4   : > { %536 = vadd.xlane.f32.xlu0 %v535_v62 }
 0x2f3   : > { %v410_v0 = vpop.xlane.xlu0 %409 }
 0x2f4   : > { %v414_v1 = vsub.f32 %v1017_v16, %v410_v0 }
 0x2f6   : > { %v416_v2 = vmul.f32 1.442695, %v414_v1 }
 0x2f8   : > { %816 = vpow2.f32 %v416_v2 }
 0x2fc   : > { %v413_v3 = vpop.xlane.xlu1 %412 }
 0x2fd   : > { %v415_v4 = vsub.f32 %v1021_v20, %v413_v3 }
 0x2ff   : > { %v418_v5 = vmul.f32 1.442695, %v415_v4 }
 0x301   : > { %818 = vpow2.f32 %v418_v5 }
 0x305   : > { %v817_v6 = vpop.eup %816 }
 0x306   : > { %v420_v7 = vsel %vm407_vm6, %v817_v6, 0.0 }
 0x307   : > { %421 = vadd.xlane.f32.xlu0 %v420_v7 }
 0x30e   : > { %v819_v8 = vpop.eup %818 }
 0x30f   : > { %v423_v9 = vsel %vm407_vm6, %v819_v8, 0.0 }
 0x310   : > { %424 = vadd.xlane.f32.xlu1 %v423_v9 }
 0x341   : > { %v455_v10 = vpop.xlane.xlu0 %454 }
 0x342   : > { %820 = vrcp.f32 %v455_v10 }
 0x345   : > { %v496_v11 = vpop.xlane.xlu0 %495 }
 0x346   : > { %822 = vrcp.f32 %v496_v11 }
 0x348   : > { %v499_v13 = vpop.xlane.xlu1 %498 }
 0x349   : > { %v458_v12 = vpop.xlane.xlu0 %457 }
 0x34a   : > { %824 = vrcp.f32 %v458_v12 }
 0x34b   : > { %826 = vrcp.f32 %v499_v13 }
 0x34c   : > { %v540_v15 = vpop.xlane.xlu1 %539 }
 0x34d   : > { %v537_v14 = vpop.xlane.xlu0 %536 }
 0x34e   : > { %828 = vrcp.f32 %v537_v14 }
 0x34f   : > { %v821_v16 = vpop.eup %820  ;;  %830 = vrcp.f32 %v540_v15 }
 0x350   : > { %v461_v17 = vmul.f32 %v821_v16, %v1035_v45 }
 0x352   : > { %465 = vrot.lane.b32.xlu0 %v461_v17, %s901_s14 }
 0x353   : > { %v823_v20 = vpop.eup %822 }
 0x354   : > { %v502_v21 = vmul.f32 %v823_v20, %v1033_v44 }
 0x356   : > { %506 = vrot.lane.b32.xlu1 %v502_v21, %s900_s13 }
 0x357   : > { %v825_v22 = vpop.eup %824 }
 0x358   : > { %v462_v23 = vmul.f32 %v825_v22, %v1041_v46  ;;  %v827_v24 = vpop.eup %826 }
 0x359   : > { %v503_v27 = vmul.f32 %v827_v24, %v1045_v47 }
 0x35a   : > { %467 = vrot.lane.b32.xlu1 %v462_v23, %s901_s14  ;;  %s836_s14 = scalar_lea.vmem %s1092_s29, 256 }
 0x35b   : > { %v829_v25 = vpop.eup %828  ;;  %p837_p11 = scmp.ne.s32.totalorder %s1092_s29, %s836_s14 }
 0x35c   : > { %v543_v26 = vmul.f32 %v829_v25, %v1047_v48  ;;  %v831_v28 = vpop.eup %830 }
 0x35d   : > { %v544_v29 = vmul.f32 %v831_v28, %v1053_v49  ;;  %v707_v49 = vld [vmem:[%s1144_s5] ss:$0 sm:$0xff]  ;;  %p838_p12 = pnand %p837_p11, %p979_p5 }
 0x35e   : > { %547 = vrot.lane.b32.xlu0 %v543_v26, %s902_s15  ;;  %508 = vrot.lane.b32.xlu1 %v503_v27, %s900_s13  ;;  %s1099_s13 = scalar_lea.sflag [#allocation3], %s243_s18 }
 0x35f   : > { %p839_p13 = pneg %p838_p12 }
 0x362   : > { %549 = vrot.lane.b32.xlu1 %v544_v29, %s902_s15  ;;  %s840_s15 = sshll.u32 %s903_s25, 4  ;;  %s841_s15 = int_to_ptr.vmem [resolvable:$false] %s840_s15 }
 0x363   : > { %s842_s16 = scalar_lea.vmem %s841_s15, 512  ;;  %p843_p0 = scmp.lt.s32.totalorder %s1092_s29, %s841_s15 }
 0x364   : > { %p844_p1 = scmp.lt.s32.totalorder %s842_s16, %s836_s14 }
 0x366   : > { %p845_p2 = por %p844_p1, %p843_p0 }
 0x368   : > { %p846_p3 = pnand %p845_p2, %p839_p13 }
 0x390   : > { %v422_v30 = vpop.xlane.xlu0 %421 }
 0x391   : > { %832 = vrcp.f32 %v422_v30 }
 0x399   : > { %v425_v31 = vpop.xlane.xlu1 %424 }
 0x39a   : > { %834 = vrcp.f32 %v425_v31 }
 0x39e   : > { %v833_v33 = vpop.eup %832 }
 0x39f   : > { %v428_v37 = vmul.f32 %v833_v33, %v817_v6 }
 0x3a7   : > { %v835_v34 = vpop.eup %834 }
 0x3a8   : > { %v429_v38 = vmul.f32 %v835_v34, %v819_v8 }
 0x3c4   : > { %v466_v36 = vpop.permute.xlu0 %465 }
 0x3c5   : > { %v471_v40 = vadd.f32 %v466_v36, %v428_v37 }
 0x3c8   : > { %v507_v32 = vpop.permute.xlu1 %506 }
 0x3c9   : > { %v512_v43 = vadd.f32 %v507_v32, %v471_v40 }
 0x3cc   : > { %v468_v35 = vpop.permute.xlu1 %467 }
 0x3cd   : > { %v472_v41 = vadd.f32 %v468_v35, %v429_v38 }
 0x3d0   : > { %v509_v39 = vpop.permute.xlu1 %508  ;;  %v548_v42 = vpop.permute.xlu0 %547 }
 0x3d1   : > { %v513_v44 = vadd.f32 %v509_v39, %v472_v41  ;;  %v553_v46 = vadd.f32 %v548_v42, %v512_v43 }
 0x3d4   : > { %v550_v45 = vpop.permute.xlu1 %549 }
 0x3d5   : > { %v554_v47 = vadd.f32 %v550_v45, %v513_v44 }
 0x3d7   : > { %v555_v48 = vpack.c.bf16 %v554_v47, %v553_v46 }
 0x3d9   : > { %748 = vmatmul.mubr.msk.bf16.vlgmr.msra.gmra.mxu0 %vm407_vm6, %v555_v48 }
 0x499   : > { %v605_v50 = vpop.f32.mrf.mxu0 }
 0x49a   : > { %v606_v51 = vadd.f32 %v707_v49, %v605_v50 }
 0x49b   : > { %v749_v52 = vpop.f32.mrf.mxu0 }
 0x49c   : > { %612 = vst [vmem:[%s245_s28] sm:$0xff] %v606_v51 }
 0x49d   : > { %v608_v53 = vpop.f32.mrf.mxu0 }
 0x49e   : > { %v609_v54 = vadd.f32 %v707_v49, %v608_v53 }
 0x49f   : > { %v750_v55 = vpop.f32.mrf.mxu0 }
 0x4a0   : > { %613 = vst [vmem:[%s245_s28 + $0x8] sm:$0xff] %v609_v54 }
 0x4a1   : > { %849 = shalt.err (!%p846_p3)
}
 0x4a2   : > { %s850_s17 = scalar_lea.hbm %s1097_s12, 256  ;;  %s854_s20 = scalar_lea.hbm %s1145_s6, 512 }
 0x4a3   : > { %p851_p4 = scmp.ne.s32.totalorder %s1097_s12, %s850_s17  ;;  %p855_p9 = scmp.lt.s32.totalorder %s1097_s12, %s1145_s6 }
 0x4a4   : > { %p856_p10 = scmp.lt.s32.totalorder %s854_s20, %s850_s17 }
 0x4a5   : > { %p852_p7 = pnand %p851_p4, %p979_p5 }
 0x4a6   : > { %p857_p11 = por %p856_p10, %p855_p9 }
 0x4a7   : > { %p853_p8 = pneg %p852_p7 }
 0x4a9   : > { %p858_p12 = pnand %p857_p11, %p853_p8 }
 0x4ab   : > { %861 = shalt.err (!%p858_p12)
}
 0x4ac   : > { %s904_s9 = smov 128   ;;  %s905_s10 = smov 8  }
 0x4ad   : > { %751 = dma.vmem_to_hbm [thread:$0]  (%p979_p5), %s1092_s29, 256, %s1097_s12, %s1099_s13, %s904_s9, %s904_s9, %s905_s10  }
 0x4ae PF: > { %p757_p13 = scmp.ge.s32.totalorder %s896_s24, 2  ;;  %s643_s11 = sand.u32 1, %s884_s21  }
 0x4af   : > { %s644_s14 = scalar_lea.sflag [#allocation3], %s643_s11 }
 0x4b0   : > { %p754_p0 = pnand %p757_p13, %p983_p6 }
 0x4b2   : > { %p755_p1 = pneg %p754_p0 }
 0x4b4   : > { %879 = dma.done.wait (%p755_p1), %s644_s14, 256  }
 0x4b5   : > { %881 = vsyncadd (%p755_p1), %s644_s14, 4294967040  ;;  %p16_p2 = scmp.ge.s32.totalorder %s966_s27, 4   ;;  %s1148_s21 = smov %s888_s22 }
 0x4b6   : > { %s1149_s22 = smov %s892_s23  ;;  %s1150_s23 = smov %s977_s30 }
 0x4b7   : > { %s1151_s24 = smov %s966_s27  ;;  %18 = sbr.rel (!%p16_p2) target bundleno = 3 (0x3), region = 79 }
 0x4bc   :  { %649 = vsyncpa [#allocation3], 1 }
 0x4bd   :  { %651 = vsyncpa [#allocation3 + $0x1], 1 }

</bundles_post_ra>
